<compile_context>
chip_gen: v7x
topology: tpu7x:2x2x1
jax: 0.10.0
libtpu: 0.0.40
codegen_flags: <defaults>
</compile_context>

<pallas_src>
import jax
import jax.numpy as jnp
from jax.experimental import pallas as pl
from jax.experimental.pallas import tpu as pltpu

_VMEM_LIMIT = 48 * 1024 * 1024
_BN_EPS = 1e-5
_LEAKY_SLOPE = 0.01


def _cparams():
    return pltpu.CompilerParams(
        dimension_semantics=("parallel",),
        vmem_limit_bytes=_VMEM_LIMIT,
    )


# --------------------------------- kernels ---------------------------------

def prep_kernel(adj_ref, x_ref, w1_ref, adj_bf_ref, dinv_ref, z1_ref):
    """Per node-row tile: bf16 adjacency copy, dinv = (rowsum(A)+2)^-1/2,
    and z1 = dinv * (x @ W1)  (prescaled input of the first propagation)."""
    a = adj_ref[...]                                                   # (TM, N) f32
    adj_bf_ref[...] = a.astype(adj_bf_ref.dtype)                       # fused cast (NEW)
    deg = jnp.sum(a, axis=1, keepdims=True) + 2.0                      # improved self loop
    dinv = jnp.where(deg > 0.0, jax.lax.rsqrt(deg), 0.0)
    dinv_ref[...] = dinv
    y = jnp.dot(x_ref[...], w1_ref[...], preferred_element_type=jnp.float32)
    z1_ref[...] = (dinv * y).astype(z1_ref.dtype)


def prop_fused_kernel(adj_ref, dinv_ref, zfull_ref, ztile_ref, b_ref, w_ref, out_ref):
    """out = dinv * (relu(dinv*(A@z) + 2*dinv*z_tile + b) @ W_next)  (next prop's z)."""
    dinv = dinv_ref[...]                                               # (TM, 1) f32
    agg = jnp.dot(adj_ref[...], zfull_ref[...],                        # bf16 x bf16 -> f32
                  preferred_element_type=jnp.float32)
    h = dinv * agg + 2.0 * dinv * ztile_ref[...] + b_ref[...]
    h = jnp.maximum(h, 0.0)                                            # ReLU
    h = jnp.dot(h, w_ref[...], preferred_element_type=jnp.float32)     # next GCN dense
    out_ref[...] = (dinv * h).astype(out_ref.dtype)


def prop_last_kernel(adj_ref, dinv_ref, zfull_ref, ztile_ref, b_ref, out_ref):
    """Final propagation (no activation): h3 = dinv*(A@z) + 2*dinv*z_tile + b."""
    dinv = dinv_ref[...]
    agg = jnp.dot(adj_ref[...], zfull_ref[...], preferred_element_type=jnp.float32)
    h = dinv * agg + 2.0 * dinv * ztile_ref[...] + b_ref[...]
    out_ref[...] = h.astype(out_ref.dtype)


def fc_tail_kernel(h_ref, bn1_ref, wf1_ref, bf1_ref, bn2_ref, wf2t_ref, bf2_ref, out_ref):
    """BN -> Linear(G->H) -> BN -> LeakyReLU -> Linear(H->1), BN with batch statistics."""
    h = h_ref[...]                                                     # (N, Gp) f32
    inv_n = 1.0 / h.shape[0]
    # BatchNorm1d (training mode, biased variance) -- one-pass statistics
    mu = jnp.sum(h, axis=0, keepdims=True) * inv_n
    var = jnp.sum(h * h, axis=0, keepdims=True) * inv_n - mu * mu
    h = (h - mu) * jax.lax.rsqrt(var + _BN_EPS) * bn1_ref[0:1, :] + bn1_ref[1:2, :]
    # Linear(gcn_feature_num -> fc_hidden)
    h = jnp.dot(h, wf1_ref[...], preferred_element_type=jnp.float32) + bf1_ref[...]
    # BatchNorm1d (training mode)
    mu = jnp.sum(h, axis=0, keepdims=True) * inv_n
    var = jnp.sum(h * h, axis=0, keepdims=True) * inv_n - mu * mu
    h = (h - mu) * jax.lax.rsqrt(var + _BN_EPS) * bn2_ref[0:1, :] + bn2_ref[1:2, :]
    # LeakyReLU (default negative_slope = 0.01)
    h = jnp.where(h >= 0.0, h, _LEAKY_SLOPE * h)
    # Linear(fc_hidden -> 1) as VPU multiply + lane reduce (avoids a 1-lane GEMV)
    out_ref[...] = jnp.sum(h * wf2t_ref[...], axis=-1, keepdims=True) + bf2_ref[...]


# --------------------------------- wrapper ---------------------------------

def _pick_block_rows(n, cap=256):
    if n <= cap:
        return n
    for tm in range(cap, 7, -8):
        if n % tm == 0:
            return tm
    return n


def std_m_gcn_forward(adj, feat, params, *, block_rows=None):
    n = adj.shape[0]
    f = feat.shape[1]
    g = params["w1"].shape[1]
    hdim = params["wf1"].shape[1]
    gp = ((g + 127) // 128) * 128            # lane-dense gcn feature width

    tm = block_rows if block_rows is not None else _pick_block_rows(n)
    assert n % tm == 0 and (tm % 8 == 0 or tm == n), "block_rows must tile N in sublane multiples"
    grid = (n // tm,)

    f32 = jnp.float32

    def padc(a, w):
        return jnp.pad(a.astype(f32), ((0, 0), (0, w - a.shape[1])))

    def padrc(a, r, w):
        return jnp.pad(a.astype(f32), ((0, r - a.shape[0]), (0, w - a.shape[1])))

    # Zero-pad the gcn feature axis to gp lanes. Padded channels stay exactly 0 through
    # every layer (BN gamma/beta padded with 0, wf1 padded rows are 0), so results match.
    w1p = padc(params["w1"], gp)
    w2p = padrc(params["w2"], gp, gp)
    w3p = padrc(params["w3"], gp, gp)
    b1p = padc(params["b1"], gp)
    b2p = padc(params["b2"], gp)
    b3p = padc(params["b3"], gp)
    bn1 = jnp.concatenate([padc(params["bn1_g"], gp), padc(params["bn1_b"], gp)], axis=0)
    wf1p = padrc(params["wf1"], gp, hdim)
    bf1 = params["bf1"].astype(f32)
    bn2 = jnp.concatenate([params["bn2_g"].astype(f32), params["bn2_b"].astype(f32)], axis=0)
    wf2t = params["wf2"].astype(f32).reshape(1, hdim)
    bf2 = params["bf2"].astype(f32)

    adj_f = adj.astype(f32)
    feat_f = feat.astype(f32)

    cp = _cparams()
    adj_spec = pl.BlockSpec((tm, n), lambda i: (i, 0))
    row_spec = lambda w: pl.BlockSpec((tm, w), lambda i: (i, 0))
    const_spec = lambda r, w: pl.BlockSpec((r, w), lambda i: (0, 0))

    # pass 0: fused bf16 cast of the adjacency + degrees + first dense layer.
    # z1 = dinv * (X @ W1) stored in bf16 (exact-0 padding lanes).
    adj_bf, dinv, z1 = pl.pallas_call(
        prep_kernel,
        grid=grid,
        in_specs=[adj_spec, row_spec(f), const_spec(f, gp)],
        out_specs=(adj_spec, row_spec(1), row_spec(gp)),
        out_shape=(jax.ShapeDtypeStruct((n, n), jnp.bfloat16),
                   jax.ShapeDtypeStruct((n, 1), f32),
                   jax.ShapeDtypeStruct((n, gp), jnp.bfloat16)),
        compiler_params=cp,
    )(adj_f, feat_f, w1p)

    def prop_fused(z, bias, w_next):
        return pl.pallas_call(
            prop_fused_kernel,
            grid=grid,
            in_specs=[adj_spec, row_spec(1), const_spec(n, gp), row_spec(gp),
                      const_spec(1, gp), const_spec(gp, gp)],
            out_specs=row_spec(gp),
            out_shape=jax.ShapeDtypeStruct((n, gp), jnp.bfloat16),
            compiler_params=cp,
        )(adj_bf, dinv, z, z, bias, w_next)

    # passes 1/2: propagation + relu + next GCN dense layer fused into the epilogue
    z2 = prop_fused(z1, b1p, w2p)
    z3 = prop_fused(z2, b2p, w3p)

    # pass 3: last propagation (no activation), f32 output feeding the BN/FC tail
    h3 = pl.pallas_call(
        prop_last_kernel,
        grid=grid,
        in_specs=[adj_spec, row_spec(1), const_spec(n, gp), row_spec(gp),
                  const_spec(1, gp)],
        out_specs=row_spec(gp),
        out_shape=jax.ShapeDtypeStruct((n, gp), f32),
        compiler_params=cp,
    )(adj_bf, dinv, z3, z3, b3p)

    # BN -> Linear -> BN -> LeakyReLU -> Linear tail: O(N*(G+H)) work, single call.
    # TODO(synk): tile the tail (two-pass BN across row tiles) if N*(gp+H)*4B exceeds VMEM.
    vmem = pl.BlockSpec(memory_space=pltpu.MemorySpace.VMEM)
    out = pl.pallas_call(
        fc_tail_kernel,
        in_specs=[vmem] * 7,
        out_specs=vmem,
        out_shape=jax.ShapeDtypeStruct((n, 1), f32),
        compiler_params=pltpu.CompilerParams(vmem_limit_bytes=_VMEM_LIMIT),
    )(h3, bn1, wf1p, bf1, bn2, wf2t, bf2)
    return out


# --------------------------------- params ---------------------------------

def make_params(key, graph_feature_num, gcn_feature_num, fc_hidden_size):
    ks = jax.random.split(key, 8)

    def glorot(k, fan_in, fan_out):
        lim = (6.0 / (fan_in + fan_out)) ** 0.5
        # stored pre-transposed as (in, out) so the kernel does x @ W
        return jax.random.uniform(k, (fan_in, fan_out), jnp.float32, -lim, lim)

    F, G, H = graph_feature_num, gcn_feature_num, fc_hidden_size
    return dict(
        # GCNConv weights (PyG: glorot weight, zero bias)
        w1=glorot(ks[0], F, G), b1=jnp.zeros((1, G), jnp.float32),
        w2=glorot(ks[1], G, G), b2=jnp.zeros((1, G), jnp.float32),
        w3=glorot(ks[2], G, G), b3=jnp.zeros((1, G), jnp.float32),
        # BatchNorm1d params (PyTorch init: gamma=1, beta=0)
        bn1_g=jnp.ones((1, G), jnp.float32), bn1_b=jnp.zeros((1, G), jnp.float32),
        bn2_g=jnp.ones((1, H), jnp.float32), bn2_b=jnp.zeros((1, H), jnp.float32),
        # Linear layers
        wf1=glorot(ks[3], G, H),
        bf1=jax.random.uniform(ks[4], (1, H), jnp.float32, -0.05, 0.05),
        wf2=glorot(ks[5], H, 1),
        bf2=jax.random.uniform(ks[6], (1, 1), jnp.float32, -0.05, 0.05),
    )


if __name__ == "__main__":
    node_num = 256
    graph_feature_num = 8
    gcn_feature_num = 32
    fc_hidden_size = 128   # small, lane-dense stand-in for the default 512

    key = jax.random.PRNGKey(0)
    k_adj, k_feat, k_par = jax.random.split(key, 3)

    adj = jax.random.bernoulli(k_adj, 0.1, (node_num, node_num)).astype(jnp.float32)
    adj = jnp.maximum(adj, adj.T)                               # symmetric undirected graph
    idx = jnp.arange(node_num)
    adj = adj.at[idx, idx].set(0.0)                             # self-loop-free adjacency
    feat = jax.random.normal(k_feat, (node_num, graph_feature_num), jnp.float32)
    params = make_params(k_par, graph_feature_num, gcn_feature_num, fc_hidden_size)

    out = std_m_gcn_forward(adj, feat, params, block_rows=128)  # grid of 2 row tiles
    jax.block_until_ready(out)
    assert out.shape == (node_num, 1) and out.dtype == jnp.float32
    assert bool(jnp.all(jnp.isfinite(out)))
    print("KERNEL_OK")
</pallas_src>

<mosaic_0001>
module attributes {stable_mosaic.version = 11 : i64} {
  func.func @prep_kernel(%arg0: i32, %arg1: memref<128x256xf32, #tpu.memory_space<vmem>>, %arg2: memref<128x8xf32, #tpu.memory_space<vmem>>, %arg3: memref<8x128xf32, #tpu.memory_space<vmem>>, %arg4: memref<128x256xbf16, #tpu.memory_space<vmem>>, %arg5: memref<128x1xf32, #tpu.memory_space<vmem>>, %arg6: memref<128x128xbf16, #tpu.memory_space<vmem>>) attributes {dimension_semantics = [#tpu.dimension_semantics<parallel>], iteration_bounds = array<i64: 2>, scalar_prefetch = 0 : i64, scratch_operands = 0 : i64, tpu.core_type = #tpu.core_type<tc>, window_params = [{transform_indices = @transform_0, window_bounds = array<i64: 128, 256>}, {transform_indices = @transform_1, window_bounds = array<i64: 128, 8>}, {pipeline_mode = #tpu.pipeline_mode<synchronous>, transform_indices = @transform_2, window_bounds = array<i64: 8, 128>}, {transform_indices = @transform_3, window_bounds = array<i64: 128, 256>}, {transform_indices = @transform_4, window_bounds = array<i64: 128, 1>}, {transform_indices = @transform_5, window_bounds = array<i64: 128, 128>}]} {
    %c0 = arith.constant 0 : index
    %c0_0 = arith.constant 0 : index
    %0 = vector.load %arg1[%c0, %c0_0] : memref<128x256xf32, #tpu.memory_space<vmem>>, vector<128x256xf32>
    %1 = arith.truncf %0 : vector<128x256xf32> to vector<128x256xbf16>
    %c0_1 = arith.constant 0 : index
    %c0_2 = arith.constant 0 : index
    %2 = vector.load %arg4[%c0_1, %c0_2] : memref<128x256xbf16, #tpu.memory_space<vmem>>, vector<128x256xbf16>
    tpu.vector_store %arg4[%c0_1, %c0_2], %1 {strides = array<i32>} : memref<128x256xbf16, #tpu.memory_space<vmem>>, vector<128x256xbf16>,
    %cst = arith.constant dense<0.000000e+00> : vector<128xf32>
    %3 = vector.multi_reduction <add>, %0, %cst [1] : vector<128x256xf32> to vector<128xf32>
    %4 = vector.shape_cast %3 : vector<128xf32> to vector<128x1xf32>
    %cst_3 = arith.constant 2.000000e+00 : f32
    %5 = vector.broadcast %cst_3 : f32 to vector<128x1xf32>
    %6 = arith.addf %4, %5 : vector<128x1xf32>
    %cst_4 = arith.constant 0.000000e+00 : f32
    %7 = vector.broadcast %cst_4 : f32 to vector<128x1xf32>
    %8 = arith.cmpf ogt, %6, %7 : vector<128x1xf32>
    %9 = math.rsqrt %6 : vector<128x1xf32>
    %cst_5 = arith.constant 0.000000e+00 : f32
    %10 = vector.broadcast %cst_5 : f32 to vector<128x1xf32>
    %11 = arith.select %8, %9, %10 : vector<128x1xi1>, vector<128x1xf32>
    %c0_6 = arith.constant 0 : index
    %c0_7 = arith.constant 0 : index
    %12 = vector.load %arg5[%c0_6, %c0_7] : memref<128x1xf32, #tpu.memory_space<vmem>>, vector<128x1xf32>
    tpu.vector_store %arg5[%c0_6, %c0_7], %11 {strides = array<i32>} : memref<128x1xf32, #tpu.memory_space<vmem>>, vector<128x1xf32>,
    %c0_8 = arith.constant 0 : index
    %c0_9 = arith.constant 0 : index
    %13 = vector.load %arg2[%c0_8, %c0_9] : memref<128x8xf32, #tpu.memory_space<vmem>>, vector<128x8xf32>
    %c0_10 = arith.constant 0 : index
    %c0_11 = arith.constant 0 : index
    %14 = vector.load %arg3[%c0_10, %c0_11] : memref<8x128xf32, #tpu.memory_space<vmem>>, vector<8x128xf32>
    %cst_12 = arith.constant dense<0.000000e+00> : vector<128x128xf32>
    %15 = tpu.matmul %13, %14, %cst_12 {dimension_numbers = #tpu.dot_dimension_numbers<[1], [0], [0], [1], [0, 0, 1, 1], [], []>} : vector<128x8xf32>, vector<8x128xf32>, vector<128x128xf32> -> vector<128x128xf32>
    %16 = vector.broadcast %11 : vector<128x1xf32> to vector<128x128xf32>
    %17 = arith.mulf %16, %15 : vector<128x128xf32>
    %18 = arith.truncf %17 : vector<128x128xf32> to vector<128x128xbf16>
    %c0_13 = arith.constant 0 : index
    %c0_14 = arith.constant 0 : index
    %19 = vector.load %arg6[%c0_13, %c0_14] : memref<128x128xbf16, #tpu.memory_space<vmem>>, vector<128x128xbf16>
    tpu.vector_store %arg6[%c0_13, %c0_14], %18 {strides = array<i32>} : memref<128x128xbf16, #tpu.memory_space<vmem>>, vector<128x128xbf16>,
    return
  }
  func.func @transform_0(%arg0: i32) -> (i32, i32) {
    %c0_i32 = arith.constant 0 : i32
    %c0_i32_0 = arith.constant 0 : i32
    return %arg0, %c0_i32 : i32, i32
  }
  func.func @transform_1(%arg0: i32) -> (i32, i32) {
    %c0_i32 = arith.constant 0 : i32
    %c0_i32_0 = arith.constant 0 : i32
    return %arg0, %c0_i32 : i32, i32
  }
  func.func @transform_2(%arg0: i32) -> (i32, i32) {
    %c0_i32 = arith.constant 0 : i32
    %c0_i32_0 = arith.constant 0 : i32
    %c0_i32_1 = arith.constant 0 : i32
    return %c0_i32, %c0_i32_0 : i32, i32
  }
  func.func @transform_3(%arg0: i32) -> (i32, i32) {
    %c0_i32 = arith.constant 0 : i32
    %c0_i32_0 = arith.constant 0 : i32
    return %arg0, %c0_i32 : i32, i32
  }
  func.func @transform_4(%arg0: i32) -> (i32, i32) {
    %c0_i32 = arith.constant 0 : i32
    %c0_i32_0 = arith.constant 0 : i32
    return %arg0, %c0_i32 : i32, i32
  }
  func.func @transform_5(%arg0: i32) -> (i32, i32) {
    %c0_i32 = arith.constant 0 : i32
    %c0_i32_0 = arith.constant 0 : i32
    return %arg0, %c0_i32 : i32, i32
  }
}

</mosaic_0001>

<bundles_post_ra>
// kernel: tpu_custom_call.1
= control target key start
LH: loop header
LB: loop body
LE: loop exit
PB: predicated region body
PF: predicated region fallthrough
CT: control target
= control target key end

     0   :  { %11 = vsyncpa [#allocation3], 0  ;;  %s1898_s0 = inlined_call_operand.hbm [shape: f32[256,256], index: 0, kind: input, shape index: {}]   ;;  %s1899_s1 = inlined_call_operand.vmem [shape: f32[256,8], index: 1, kind: input, shape index: {}]   ;;  %s1900_s2 = inlined_call_operand.vmem [shape: f32[8,128], index: 2, kind: input, shape index: {}]   ;;  %s1901_s3 = inlined_call_operand.hbm [shape: bf16[256,256], index: 3, kind: output, shape index: {0}]   ;;  %s1902_s4 = inlined_call_operand.vmem [shape: f32[256,1], index: 4, kind: output, shape index: {1}]   ;;  %s1903_s5 = inlined_call_operand.hbm [shape: bf16[256,128], index: 5, kind: output, shape index: {2}]  }
   0x1   :  { %13 = vsyncpa [#allocation3 + $0x1], 0 }
   0x2   :  { %14 = vsyncpa [#allocation4], 0 }
   0x3   :  { %16 = vsyncpa [#allocation4 + $0x1], 0 }
   0x4   :  { %17 = vsyncpa [#allocation7], 0 }
   0x5   :  { %19 = vsyncpa [#allocation7 + $0x1], 0  ;;  %s1519_s18 = smov 0   ;;  %s1521_s19 = smov 0  }
   0x6   :  { %s1523_s20 = smov 0   ;;  %s1525_s21 = smov 0  }
   0x7 LB: > { %s1540_s22 = sadd.s32 4294967295, %s1478_s21   ;;  %s1060_s23 = sadd.s32 4294967294, %s1478_s21   ;;  %s1478_s21 = sphi %s1525_s21, %s1916_s21   ;;  %s1474_s20 = sphi %s1523_s20, %s1915_s20   ;;  %s1470_s19 = sphi %s1521_s19, %s1914_s19   ;;  %s1466_s18 = sphi %s1519_s18, %s1913_s18  }
   0x8   : > { %s1544_s24 = sadd.s32 1, %s1478_s21   ;;  %s32_s25 = sadd.s32 1, %s1474_s20 }
   0x9   : > { %s29_s26 = ssub.s32 %s1478_s21, %s1544_s24  ;;  %p39_p0 = scmp.ne.s32.totalorder %s1474_s20, %s1470_s19 }
   0xa   : > { %p30_p1 = scmp.eq.s32.totalorder %s29_s26, 0  ;;  %p40_p2 = scmp.eq.s32.totalorder %s1478_s21, 0 }
   0xb   : > { %p45_p3 = scmp.ne.s32.totalorder %s1470_s19, %s1466_s18  ;;  %p46_p4 = scmp.eq.s32.totalorder %s1540_s22, 0 }
   0xc   : > { %s1556_s27 = scalar_select %p30_p1, %s1474_s20, %s32_s25  }
   0xd   : > { %p1558_p5 = por %p40_p2, %p39_p0  ;;  %p1562_p6 = por %p46_p4, %p45_p3 }
   0xe   : > { %p116_p7 = scmp.eq.s32.totalorder %s1540_s22, 1  ;;  %p122_p8 = scmp.eq.s32.totalorder %s1060_s23, 1 }
   0xf   : > { %p1278_p10 = scmp.lt.s32.totalorder %s1478_s21, 2  ;;  %s197_s7 = sand.u32 1, %s1474_s20  }
  0x10   : > { %p1569_p11 = por %p116_p7, %p39_p0  ;;  %p1573_p12 = por %p122_p8, %p45_p3 }
  0x11   : > { %s1133_s8 = sshll.u32 %s1478_s21, 12  ;;  %s1063_s9 = sshll.u32 %s197_s7, 8 }
  0x12   : > { %s1907_s30 = scalar_select %p1569_p11, 1, 0 }
  0x13   : > { %s1908_s6 = scalar_select %p1573_p12, 1, 0 }
  0x14   : > { %s1582_s12 = scalar_lea.hbm %s1898_s0, %s1133_s8  ;;  %s201_s13 = scalar_lea.vmem [#allocation2], %s1063_s9 }
  0x15   : > { %s209_s14 = sshll.u32 %s201_s13, 4  ;;  %p1586_p13 = pnand %p1278_p10, %p1558_p5  ;;  %s1590_s14 = int_to_ptr.vmem [resolvable:$true] %s209_s14 }
  0x16   : > { %s1592_s16 = scalar_lea.sflag [#allocation3], %s197_s7  ;;  %s1350_s17 = scalar_lea.hbm %s1582_s12, 4096 }
  0x17   : > { %p1351_p0 = scmp.ne.s32.totalorder %s1582_s12, %s1350_s17  ;;  %p1352_p1 = pneg %p1586_p13 }
  0x18   : > { %s1355_s26 = scalar_lea.hbm %s1898_s0, 8192  ;;  %p1356_p4 = scmp.lt.u32.totalorder %s1582_s12, %s1898_s0 }
  0x19   : > { %p1353_p2 = pnand %p1352_p1, %p1351_p0  ;;  %p1357_p5 = scmp.lt.u32.totalorder %s1355_s26, %s1350_s17 }
  0x1a   : > { %p1359_p8 = scmp.lt.u32.totalorder %s1350_s17, %s1582_s12 }
  0x1b   : > { %p1354_p3 = pneg %p1353_p2  ;;  %p1358_p7 = por %p1357_p5, %p1356_p4 }
  0x1d   : > { %p1360_p10 = por %p1359_p8, %p1358_p7 }
  0x1f   : > { %p1361_p9 = pnand %p1360_p10, %p1354_p3 }
  0x21   : > { %1364 = shalt.err (!%p1361_p9)
}
  0x22   : > { %s1365_s7 = scalar_lea.vmem %s1590_s14, 4096  ;;  %s1480_s9 = smov [#allocation2]  }
  0x23   : > { %p1366_p0 = scmp.ne.s32.totalorder %s1590_s14, %s1365_s7  ;;  %s1370_s10 = sshll.u32 %s1480_s9, 4  ;;  %s1371_s10 = int_to_ptr.vmem [resolvable:$false] %s1370_s10 }
  0x24   : > { %s1372_s11 = scalar_lea.vmem %s1371_s10, 8192  ;;  %p1373_p11 = scmp.lt.s32.totalorder %s1590_s14, %s1371_s10 }
  0x25   : > { %p1368_p2 = pnand %p1366_p0, %p1352_p1  ;;  %p1374_p4 = scmp.lt.s32.totalorder %s1372_s11, %s1365_s7 }
  0x27   : > { %p1369_p12 = pneg %p1368_p2  ;;  %p1375_p5 = por %p1374_p4, %p1373_p11 }
  0x29   : > { %p1376_p7 = pnand %p1375_p5, %p1369_p12 }
  0x2b   : > { %1379 = shalt.err (!%p1376_p7)
}
  0x2c   : > { %s1481_s13 = smov 256   ;;  %s1482_s17 = smov 16  }
  0x2d   : > { %1270 = dma.hbm_to_vmem [thread:$0]  (!%p1586_p13), %s1582_s12, 4096, %s1590_s14, %s1592_s16, %s1481_s13, %s1481_s13, %s1482_s17  }
  0x2e   : > { %p1067_p9 = scmp.ge.s32.totalorder %s1478_s21, 1  ;;  %p226_p1 = scmp.lt.s32.totalorder %s1478_s21, 3 }
  0x30   : > { %p227_p3 = pnand %p1067_p9, %p226_p1 }
  0x31   : > { %s1623_s23 = sand.u32 (!%p227_p3), 1, %s1470_s19  }
  0x32   : > { %230 = sbr.rel (%p227_p3) target bundleno = 311 (0x137), region = 32  ;;  %s1068_s25 = sshll.u32 (!%p227_p3), %s1623_s23, 8 }
  0x33   : > { %s233_s26 = scalar_lea.sflag (!%p227_p3), [#allocation3], %s1623_s23  ;;  %s1627_s28 = scalar_lea.vmem (!%p227_p3), [#allocation2], %s1068_s25 }
  0x39   : > { %1453 = dma.done.wait (%p1562_p6), %s233_s26, 4096  }
  0x3a   : > { %1455 = vsyncadd (%p1562_p6), %s233_s26, 4294963200  ;;  %s1071_s12 = sshll.u32 %s1540_s22, 4  ;;  %v582_v0 = vld [vmem:[%s1900_s2] sm:$0xff]  ;;  %vm583_vm0 = vcmask 64512   ;;  %s1069_s29 = sshll.u32 %s1623_s23, 7  ;;  %v298_v12 = vld [vmem:[%s1627_s28 + $0x28] sm:$0xff] }
  0x3b   : > { %p280_p11 = scmp.lt.s32.totalorder %s1071_s12, 31  ;;  %1233 = vmatprep.subr.mxu0 %v582_v0  ;;  %1259 = vmatprep.subr.mxu1 %v582_v0  ;;  %v297_v11 = vld [vmem:[%s1627_s28 + $0x20] sm:$0xff]  ;;  %v294_v14 = vld [vmem:[%s1627_s28 + $0x8] sm:$0xff]  ;;  %v299_v21 = vld [vmem:[%s1627_s28 + $0x30] sm:$0xff]  ;;  %s1684_s10 = scalar_lea.vmem [#allocation5], %s1069_s29 }
  0x3c   : > { %1234 = vmatpush3.msra.mxu0 %v582_v0  ;;  %1260 = vmatpush3.msra.mxu1 %v582_v0  ;;  %v293_v13 = vld [vmem:[%s1627_s28] sm:$0xff]  ;;  %v443_v17 = vadd.f32 %v298_v12, %v297_v11  ;;  %v1136_v18 = vpack.c.bf16 %v298_v12, %v297_v11  ;;  %v300_v22 = vld [vmem:[%s1627_s28 + $0x38] sm:$0xff]  ;;  %v295_v23 = vld [vmem:[%s1627_s28 + $0x10] sm:$0xff]  ;;  %s1167_s11 = sshll.u32 %s1540_s22, 11  ;;  %s898_s13 = sshll.u32 %s1684_s10, 4  ;;  %s1739_s13 = int_to_ptr.vmem [resolvable:$true] %s898_s13 }
  0x3d   : > { %s1918_s12 = smov (!%p280_p11, %s1071_s12), 31  ;;  %v437_v19 = vadd.f32 %v294_v14, %v293_v13  ;;  %v1134_v20 = vpack.c.bf16 %v294_v14, %v293_v13  ;;  %v1137_v26 = vpack.c.bf16 %v300_v22, %v299_v21  ;;  %v296_v27 = vld [vmem:[%s1627_s28 + $0x18] sm:$0xff]  ;;  %v303_v28 = vld [vmem:[%s1627_s28 + $0x50] sm:$0xff]  ;;  %v301_v32 = vld [vmem:[%s1627_s28 + $0x40] sm:$0xff]  ;;  %v446_v35 = vadd.f32 %v300_v22, %v299_v21  ;;  %s1737_s26 = scalar_lea.hbm %s1901_s3, %s1167_s11 }
  0x3e   : > { %s1072_s14 = sshll.u32 %s1918_s12, 3  ;;  %v304_v29 = vld [vmem:[%s1627_s28 + $0x58] sm:$0xff]  ;;  %423 = vst [vmem:[%s1684_s10 + $0x10] sm:$0xff] %v1136_v18  ;;  %v1135_v30 = vpack.c.bf16 %v296_v27, %v295_v23  ;;  %v302_v33 = vld [vmem:[%s1627_s28 + $0x48] sm:$0xff]  ;;  %v307_v34 = vld [vmem:[%s1627_s28 + $0x70] sm:$0xff]  ;;  %444 = vadd.xlane.f32.xlu1 %v443_v17  ;;  %v440_v36 = vadd.f32 %v296_v27, %v295_v23  ;;  %s1380_s15 = scalar_lea.vmem %s1739_s13, 2048 }
  0x3f   : > { %s1642_s8 = scalar_lea.vmem %s1899_s1, %s1072_s14  ;;  %421 = vst [vmem:[%s1684_s10] sm:$0xff] %v1134_v20  ;;  %v1139_v31 = vpack.c.bf16 %v304_v29, %v303_v28  ;;  %438 = vadd.xlane.f32.xlu0 %v437_v19  ;;  %424 = vst [vmem:[%s1684_s10 + $0x18] sm:$0xff] %v1137_v26  ;;  %v1138_v37 = vpack.c.bf16 %v302_v33, %v301_v32  ;;  %v308_v38 = vld [vmem:[%s1627_s28 + $0x78] sm:$0xff]  ;;  %v305_v39 = vld [vmem:[%s1627_s28 + $0x60] sm:$0xff]  ;;  %v452_v57 = vadd.f32 %v304_v29, %v303_v28  ;;  %p1381_p6 = scmp.ne.s32.totalorder %s1739_s13, %s1380_s15 }
  0x40   : > { %v566_v1 = vld [vmem:[%s1642_s8] sm:$0xff]  ;;  %v567_v3 = vld [vmem:[%s1642_s8 + $0x8] sm:$0xff]  ;;  %v568_v5 = vld [vmem:[%s1642_s8 + $0x10] sm:$0xff]  ;;  %422 = vst [vmem:[%s1684_s10 + $0x8] sm:$0xff] %v1135_v30  ;;  %v1141_v43 = vpack.c.bf16 %v308_v38, %v307_v34  ;;  %v449_v58 = vadd.f32 %v302_v33, %v301_v32  ;;  %p1910_p12 = scmp.ne.s32.totalorder %s1907_s30, 0  ;;  %s1483_s16 = smov [#allocation5]  }
  0x41   : > { %v574_v2 = vld [vmem:[%s1642_s8 + $0x40] sm:$0xff]  ;;  %v575_v4 = vld [vmem:[%s1642_s8 + $0x48] sm:$0xff]  ;;  %v576_v6 = vld [vmem:[%s1642_s8 + $0x50] sm:$0xff]  ;;  %1235 = vmatprep.mubr.msk.f32.mxu0 %vm583_vm0, %v566_v1  ;;  %426 = vst [vmem:[%s1684_s10 + $0x28] sm:$0xff] %v1139_v31 }
  0x42   : > { %1247 = vmatprep.mubr.msk.f32.mxu1 %vm583_vm0, %v574_v2  ;;  %1236 = vmatmul.mubr.msk.f32.vlgmr.msra.gmra.mrb[0].mxu0 %vm583_vm0, %v567_v3  ;;  %v569_v7 = vld [vmem:[%s1642_s8 + $0x18] sm:$0xff]  ;;  %v570_v9 = vld [vmem:[%s1642_s8 + $0x20] sm:$0xff]  ;;  %v571_v15 = vld [vmem:[%s1642_s8 + $0x28] sm:$0xff]  ;;  %425 = vst [vmem:[%s1684_s10 + $0x20] sm:$0xff] %v1138_v37  ;;  %p1382_p13 = pnand %p1381_p6, %p1910_p12 }
  0x43   : > { %1248 = vmatmul.mubr.msk.f32.vlgmr.msra.gmra.mrb[0].mxu1 %vm583_vm0, %v575_v4  ;;  %v577_v8 = vld [vmem:[%s1642_s8 + $0x58] sm:$0xff]  ;;  %1238 = vmatprep.mubr.msk.f32.mxu0 %vm583_vm0, %v568_v5  ;;  %v578_v10 = vld [vmem:[%s1642_s8 + $0x60] sm:$0xff]  ;;  %v579_v16 = vld [vmem:[%s1642_s8 + $0x68] sm:$0xff]  ;;  %428 = vst [vmem:[%s1684_s10 + $0x38] sm:$0xff] %v1141_v43 }
  0x44   : > { %1250 = vmatprep.mubr.msk.f32.mxu1 %vm583_vm0, %v576_v6  ;;  %v572_v24 = vld [vmem:[%s1642_s8 + $0x30] sm:$0xff]  ;;  %v306_v40 = vld [vmem:[%s1627_s28 + $0x68] sm:$0xff]  ;;  %v573_v41 = vld [vmem:[%s1642_s8 + $0x38] sm:$0xff]  ;;  %447 = vadd.xlane.f32.xlu1 %v446_v35  ;;  %p1383_p8 = pneg %p1382_p13 }
  0x45   : > { %v580_v25 = vld [vmem:[%s1642_s8 + $0x70] sm:$0xff]  ;;  %v581_v42 = vld [vmem:[%s1642_s8 + $0x78] sm:$0xff]  ;;  %v1140_v44 = vpack.c.bf16 %v306_v40, %v305_v39  ;;  %v309_v47 = vld [vmem:[%s1627_s28 + $0x80] sm:$0xff]  ;;  %441 = vadd.xlane.f32.xlu0 %v440_v36  ;;  %s1384_s8 = sshll.u32 %s1483_s16, 4  ;;  %s1385_s8 = int_to_ptr.vmem [resolvable:$false] %s1384_s8 }
  0x46   : > { %1239 = vmatmul.mubr.msk.f32.gmra.mrb[2].mxu0 %vm583_vm0, %v569_v7  ;;  %v311_v45 = vld [vmem:[%s1627_s28 + $0x90] sm:$0xff]  ;;  %v312_v46 = vld [vmem:[%s1627_s28 + $0x98] sm:$0xff]  ;;  %v310_v49 = vld [vmem:[%s1627_s28 + $0x88] sm:$0xff]  ;;  %v458_v7 = vadd.f32 %v308_v38, %v307_v34  ;;  %s1386_s7 = scalar_lea.vmem %s1385_s8, 4096  ;;  %p1387_p10 = scmp.lt.s32.totalorder %s1739_s13, %s1385_s8 }
  0x47   : > { %1251 = vmatmul.mubr.msk.f32.gmra.mrb[2].mxu1 %vm583_vm0, %v577_v8  ;;  %1241 = vmatprep.mubr.msk.f32.mxu0 %vm583_vm0, %v570_v9  ;;  %v1143_v48 = vpack.c.bf16 %v312_v46, %v311_v45  ;;  %v315_v50 = vld [vmem:[%s1627_s28 + $0xb0] sm:$0xff]  ;;  %v316_v51 = vld [vmem:[%s1627_s28 + $0xb8] sm:$0xff]  ;;  %427 = vst [vmem:[%s1684_s10 + $0x30] sm:$0xff] %v1140_v44  ;;  %v1142_v52 = vpack.c.bf16 %v310_v49, %v309_v47  ;;  %v313_v54 = vld [vmem:[%s1627_s28 + $0xa0] sm:$0xff]  ;;  %p1388_p0 = scmp.lt.s32.totalorder %s1386_s7, %s1380_s15 }
  0x48   : > { %1253 = vmatprep.mubr.msk.f32.mxu1 %vm583_vm0, %v578_v10  ;;  %v1145_v53 = vpack.c.bf16 %v316_v51, %v315_v50  ;;  %v314_v55 = vld [vmem:[%s1627_s28 + $0xa8] sm:$0xff]  ;;  %v319_v56 = vld [vmem:[%s1627_s28 + $0xd0] sm:$0xff]  ;;  %v320_v60 = vld [vmem:[%s1627_s28 + $0xd8] sm:$0xff]  ;;  %453 = vadd.xlane.f32.xlu1 %v452_v57  ;;  %v455_v8 = vadd.f32 %v306_v40, %v305_v39  ;;  %v464_v9 = vadd.f32 %v312_v46, %v311_v45 }
  0x49   : > { %430 = vst [vmem:[%s1684_s10 + $0x48] sm:$0xff] %v1143_v48  ;;  %v1144_v59 = vpack.c.bf16 %v314_v55, %v313_v54  ;;  %v317_v61 = vld [vmem:[%s1627_s28 + $0xc0] sm:$0xff]  ;;  %v318_v62 = vld [vmem:[%s1627_s28 + $0xc8] sm:$0xff]  ;;  %429 = vst [vmem:[%s1684_s10 + $0x40] sm:$0xff] %v1142_v52  ;;  %v1147_v63 = vpack.c.bf16 %v320_v60, %v319_v56  ;;  %450 = vadd.xlane.f32.xlu0 %v449_v58  ;;  %v461_v10 = vadd.f32 %v310_v49, %v309_v47  ;;  %p1389_p2 = por %p1388_p0, %p1387_p10 }
  0x4a   : > { %1242 = vmatmul.mubr.msk.f32.gmra.mrb[4].mxu0 %vm583_vm0, %v571_v15  ;;  %432 = vst [vmem:[%s1684_s10 + $0x58] sm:$0xff] %v1145_v53  ;;  %v1146_v0 = vpack.c.bf16 %v318_v62, %v317_v61  ;;  %v323_v1 = vld [vmem:[%s1627_s28 + $0xf0] sm:$0xff]  ;;  %v324_v2 = vld [vmem:[%s1627_s28 + $0xf8] sm:$0xff]  ;;  %v321_v4 = vld [vmem:[%s1627_s28 + $0xe0] sm:$0xff]  ;;  %v470_v11 = vadd.f32 %v316_v51, %v315_v50  ;;  %v467_v12 = vadd.f32 %v314_v55, %v313_v54 }
  0x4b   : > { %1254 = vmatmul.mubr.msk.f32.gmra.mrb[4].mxu1 %vm583_vm0, %v579_v16  ;;  %1244 = vmatprep.mubr.msk.f32.mxu0 %vm583_vm0, %v572_v24  ;;  %431 = vst [vmem:[%s1684_s10 + $0x50] sm:$0xff] %v1144_v59  ;;  %v1149_v3 = vpack.c.bf16 %v324_v2, %v323_v1  ;;  %v322_v5 = vld [vmem:[%s1627_s28 + $0xe8] sm:$0xff]  ;;  %434 = vst [vmem:[%s1684_s10 + $0x68] sm:$0xff] %v1147_v63  ;;  %v476_v13 = vadd.f32 %v320_v60, %v319_v56  ;;  %s874_s28 = scalar_lea.sflag [#allocation4], %s1623_s23  ;;  %p1390_p4 = pnand %p1389_p2, %p1383_p8 }
  0x4c   : > { %1256 = vmatprep.mubr.msk.f32.mxu1 %vm583_vm0, %v580_v25  ;;  %433 = vst [vmem:[%s1684_s10 + $0x60] sm:$0xff] %v1146_v0  ;;  %v1148_v6 = vpack.c.bf16 %v322_v5, %v321_v4  ;;  %459 = vadd.xlane.f32.xlu1 %v458_v7  ;;  %v473_v14 = vadd.f32 %v318_v62, %v317_v61 }
  0x4d   : > { %436 = vst [vmem:[%s1684_s10 + $0x78] sm:$0xff] %v1149_v3  ;;  %456 = vadd.xlane.f32.xlu0 %v455_v8  ;;  %v482_v15 = vadd.f32 %v324_v2, %v323_v1  ;;  %v479_v16 = vadd.f32 %v322_v5, %v321_v4 }
  0x4e   : > { %1245 = vmatmul.mubr.msk.f32.gmra.mrb[6].mxu0 %vm583_vm0, %v573_v41  ;;  %435 = vst [vmem:[%s1684_s10 + $0x70] sm:$0xff] %v1148_v6 }
  0x4f   : > { %1257 = vmatmul.mubr.msk.f32.gmra.mrb[6].mxu1 %vm583_vm0, %v581_v42 }
  0x50   : > { %465 = vadd.xlane.f32.xlu1 %v464_v9 }
  0x51   : > { %462 = vadd.xlane.f32.xlu0 %v461_v10 }
  0x54   : > { %471 = vadd.xlane.f32.xlu1 %v470_v11 }
  0x55   : > { %468 = vadd.xlane.f32.xlu0 %v467_v12 }
  0x58   : > { %477 = vadd.xlane.f32.xlu1 %v476_v13 }
  0x59   : > { %474 = vadd.xlane.f32.xlu0 %v473_v14 }
  0x5c   : > { %483 = vadd.xlane.f32.xlu1 %v482_v15 }
  0x5d   : > { %480 = vadd.xlane.f32.xlu0 %v479_v16 }
  0x5e   : > { %1393 = shalt.err (!%p1390_p4)
}
  0x5f   : > { %s1394_s9 = scalar_lea.hbm %s1737_s26, 2048  ;;  %s1398_s11 = scalar_lea.hbm %s1901_s3, 4096 }
  0x60   : > { %p1395_p5 = scmp.ne.s32.totalorder %s1737_s26, %s1394_s9  ;;  %p1399_p1 = scmp.lt.u32.totalorder %s1737_s26, %s1901_s3 }
  0x61   : > { %p1400_p3 = scmp.lt.u32.totalorder %s1398_s11, %s1394_s9  ;;  %p1402_p6 = scmp.lt.u32.totalorder %s1394_s9, %s1737_s26 }
  0x62   : > { %p1396_p7 = pnand %p1395_p5, %p1910_p12 }
  0x63   : > { %p1401_p11 = por %p1400_p3, %p1399_p1 }
  0x64   : > { %p1397_p9 = pneg %p1396_p7 }
  0x65   : > { %p1403_p13 = por %p1402_p6, %p1401_p11 }
  0x67   : > { %p1404_p8 = pnand %p1403_p13, %p1397_p9 }
  0x69   : > { %1407 = shalt.err (!%p1404_p8)
}
  0x6a   : > { %s1484_s15 = smov 128   ;;  %s1485_s16 = smov 8   ;;  %vm549_vm2 = vcmask 7168  }
  0x6b   : > { %1263 = dma.vmem_to_hbm [thread:$0]  (%p1910_p12), %s1739_s13, 2048, %s1737_s26, %s874_s28, %s1484_s15, %s1484_s15, %s1485_s16  }
  0x6c   : > { %s1770_s28 = scalar_lea.vmem %s1902_s4, %s1072_s14  ;;  %s1070_s12 = sshll.u32 %s1623_s23, 6 }
  0x6d   : > { %s1832_s14 = scalar_lea.vmem [#allocation6], %s1070_s12  ;;  %s1168_s7 = sshll.u32 %s1540_s22, 10 }
  0x6e   : > { %s918_s8 = sshll.u32 %s1832_s14, 4  ;;  %s1852_s10 = scalar_lea.hbm %s1903_s5, %s1168_s7  ;;  %s1844_s8 = int_to_ptr.vmem [resolvable:$true] %s918_s8 }
  0x6f   : > { %s884_s22 = scalar_lea.sflag [#allocation7], %s1623_s23  ;;  %s1408_s11 = scalar_lea.vmem %s1844_s8, 1024 }
  0x70   : > { %p1409_p10 = scmp.ne.s32.totalorder %s1844_s8, %s1408_s11  ;;  %s1486_s17 = smov [#allocation6]  }
  0x71   : > { %s1412_s25 = sshll.u32 %s1486_s17, 4  ;;  %s1413_s25 = int_to_ptr.vmem [resolvable:$false] %s1412_s25 }
  0x72   : > { %p1410_p0 = pnand %p1409_p10, %p1910_p12  ;;  %s1414_s15 = scalar_lea.vmem %s1413_s25, 2048 }
  0x73   : > { %p1415_p4 = scmp.lt.s32.totalorder %s1844_s8, %s1413_s25  ;;  %p1416_p5 = scmp.lt.s32.totalorder %s1414_s15, %s1408_s11 }
  0x74   : > { %p1411_p2 = pneg %p1410_p0 }
  0x75   : > { %p1417_p7 = por %p1416_p5, %p1415_p4 }
  0x77   : > { %p1418_p9 = pnand %p1417_p7, %p1411_p2 }
  0xcb   : > { %v445_v17 = vpop.xlane.xlu1 %444 }
  0xcc   : > { %v439_v18 = vpop.xlane.xlu0 %438  ;;  %v487_v19 = vadd.f32 2.0, %v445_v17 }
  0xcd   : > { %v485_v20 = vadd.f32 2.0, %v439_v18 }
  0xce   : > { %1318 = vrsqrt.f32 %v487_v19  ;;  %vm503_vm1 = vcmp.gt.f32.partialorder %v487_v19, 0.0 }
  0xcf   : > { %1320 = vrsqrt.f32 %v485_v20  ;;  %vm501_vm3 = vcmp.gt.f32.partialorder %v485_v20, 0.0 }
  0xd1   : > { %v448_v21 = vpop.xlane.xlu1 %447 }
  0xd2   : > { %v442_v22 = vpop.xlane.xlu0 %441  ;;  %v488_v23 = vadd.f32 2.0, %v448_v21 }
  0xd3   : > { %v486_v24 = vadd.f32 2.0, %v442_v22 }
  0xd4   : > { %1322 = vrsqrt.f32 %v488_v23  ;;  %vm504_vm4 = vcmp.gt.f32.partialorder %v488_v23, 0.0 }
  0xd5   : > { %1324 = vrsqrt.f32 %v486_v24  ;;  %v454_v25 = vpop.xlane.xlu1 %453  ;;  %vm502_vm5 = vcmp.gt.f32.partialorder %v486_v24, 0.0 }
  0xd6   : > { %v451_v26 = vpop.xlane.xlu0 %450  ;;  %v490_v27 = vadd.f32 2.0, %v454_v25 }
  0xd7   : > { %v489_v28 = vadd.f32 2.0, %v451_v26 }
  0xd8   : > { %1326 = vrsqrt.f32 %v490_v27  ;;  %v1319_v31 = vpop.eup %1318  ;;  %vm506_vm6 = vcmp.gt.f32.partialorder %v490_v27, 0.0 }
  0xd9   : > { %1328 = vrsqrt.f32 %v489_v28  ;;  %v460_v29 = vpop.xlane.xlu1 %459  ;;  %v1321_v34 = vpop.eup %1320  ;;  %v1772_v35 = vsel %vm503_vm1, %v1319_v31, 0.0  ;;  %vm505_vm7 = vcmp.gt.f32.partialorder %v489_v28, 0.0 }
  0xda   : > { %v457_v30 = vpop.xlane.xlu0 %456  ;;  %v492_v32 = vadd.f32 2.0, %v460_v29  ;;  %v1774_v36 = vsel %vm501_vm3, %v1321_v34, 0.0  ;;  %552 = vst.msk [vmem:[%s1770_s28 + $0x10] sm:$0xff] %vm549_vm2, %v1772_v35 }
  0xdb   : > { %v491_v33 = vadd.f32 2.0, %v457_v30  ;;  %550 = vst.msk [vmem:[%s1770_s28] sm:$0xff] %vm549_vm2, %v1774_v36 }
  0xdc   : > { %1330 = vrsqrt.f32 %v492_v32  ;;  %vm508_vm8 = vcmp.gt.f32.partialorder %v492_v32, 0.0 }
  0xdd   : > { %1332 = vrsqrt.f32 %v491_v33  ;;  %v466_v37 = vpop.xlane.xlu1 %465  ;;  %vm507_vm9 = vcmp.gt.f32.partialorder %v491_v33, 0.0 }
  0xde   : > { %v463_v38 = vpop.xlane.xlu0 %462  ;;  %v1323_v39 = vpop.eup %1322  ;;  %v494_v40 = vadd.f32 2.0, %v466_v37 }
  0xdf   : > { %v493_v41 = vadd.f32 2.0, %v463_v38  ;;  %v1325_v42 = vpop.eup %1324  ;;  %v1782_v43 = vsel %vm504_vm4, %v1323_v39, 0.0 }
  0xe0   : > { %1334 = vrsqrt.f32 %v494_v40  ;;  %v1784_v44 = vsel %vm502_vm5, %v1325_v42, 0.0  ;;  %553 = vst.msk [vmem:[%s1770_s28 + $0x18] sm:$0xff] %vm549_vm2, %v1782_v43  ;;  %vm510_vm10 = vcmp.gt.f32.partialorder %v494_v40, 0.0 }
  0xe1   : > { %1336 = vrsqrt.f32 %v493_v41  ;;  %v472_v45 = vpop.xlane.xlu1 %471  ;;  %551 = vst.msk [vmem:[%s1770_s28 + $0x8] sm:$0xff] %vm549_vm2, %v1784_v44  ;;  %vm509_vm11 = vcmp.gt.f32.partialorder %v493_v41, 0.0 }
  0xe2   : > { %v469_v46 = vpop.xlane.xlu0 %468  ;;  %v1327_v47 = vpop.eup %1326  ;;  %v496_v48 = vadd.f32 2.0, %v472_v45 }
  0xe3   : > { %v495_v49 = vadd.f32 2.0, %v469_v46  ;;  %v1329_v50 = vpop.eup %1328  ;;  %v1792_v51 = vsel %vm506_vm6, %v1327_v47, 0.0 }
  0xe4   : > { %1338 = vrsqrt.f32 %v496_v48  ;;  %555 = vst.msk [vmem:[%s1770_s28 + $0x28] sm:$0xff] %vm549_vm2, %v1792_v51  ;;  %v1797_v52 = vsel %vm505_vm7, %v1329_v50, 0.0  ;;  %vm512_vm12 = vcmp.gt.f32.partialorder %v496_v48, 0.0 }
  0xe5   : > { %1340 = vrsqrt.f32 %v495_v49  ;;  %v478_v53 = vpop.xlane.xlu1 %477  ;;  %554 = vst.msk [vmem:[%s1770_s28 + $0x20] sm:$0xff] %vm549_vm2, %v1797_v52  ;;  %vm511_vm13 = vcmp.gt.f32.partialorder %v495_v49, 0.0 }
  0xe6   : > { %v475_v54 = vpop.xlane.xlu0 %474  ;;  %v1331_v55 = vpop.eup %1330  ;;  %v498_v56 = vadd.f32 2.0, %v478_v53 }
  0xe7   : > { %v497_v57 = vadd.f32 2.0, %v475_v54  ;;  %v1333_v58 = vpop.eup %1332  ;;  %v1802_v59 = vsel %vm508_vm8, %v1331_v55, 0.0 }
  0xe8   : > { %1342 = vrsqrt.f32 %v498_v56  ;;  %557 = vst.msk [vmem:[%s1770_s28 + $0x38] sm:$0xff] %vm549_vm2, %v1802_v59  ;;  %v1807_v60 = vsel %vm507_vm9, %v1333_v58, 0.0  ;;  %vm514_vm14 = vcmp.gt.f32.partialorder %v498_v56, 0.0 }
  0xe9   : > { %1344 = vrsqrt.f32 %v497_v57  ;;  %v484_v61 = vpop.xlane.xlu1 %483  ;;  %556 = vst.msk [vmem:[%s1770_s28 + $0x30] sm:$0xff] %vm549_vm2, %v1807_v60  ;;  %vm513_vm15 = vcmp.gt.f32.partialorder %v497_v57, 0.0 }
  0xea   : > { %v481_v62 = vpop.xlane.xlu0 %480  ;;  %v1335_v63 = vpop.eup %1334  ;;  %v500_v0 = vadd.f32 2.0, %v484_v61 }
  0xeb   : > { %v499_v1 = vadd.f32 2.0, %v481_v62  ;;  %v1337_v2 = vpop.eup %1336  ;;  %v542_v3 = vsel %vm510_vm10, %v1335_v63, 0.0 }
  0xec   : > { %1346 = vrsqrt.f32 %v500_v0  ;;  %559 = vst.msk [vmem:[%s1770_s28 + $0x48] sm:$0xff] %vm549_vm2, %v542_v3  ;;  %v541_v4 = vsel %vm509_vm11, %v1337_v2, 0.0  ;;  %vm516_vm0 = vcmp.gt.f32.partialorder %v500_v0, 0.0 }
  0xed   : > { %1348 = vrsqrt.f32 %v499_v1  ;;  %558 = vst.msk [vmem:[%s1770_s28 + $0x40] sm:$0xff] %vm549_vm2, %v541_v4  ;;  %vm515_vm1 = vcmp.gt.f32.partialorder %v499_v1, 0.0 }
  0xee   : > { %v1339_v5 = vpop.eup %1338 }
  0xef   : > { %v1341_v6 = vpop.eup %1340  ;;  %v544_v7 = vsel %vm512_vm12, %v1339_v5, 0.0 }
  0xf0   : > { %561 = vst.msk [vmem:[%s1770_s28 + $0x58] sm:$0xff] %vm549_vm2, %v544_v7  ;;  %v543_v8 = vsel %vm511_vm13, %v1341_v6, 0.0 }
  0xf1   : > { %560 = vst.msk [vmem:[%s1770_s28 + $0x50] sm:$0xff] %vm549_vm2, %v543_v8 }
  0xf2   : > { %v1343_v9 = vpop.eup %1342 }
  0xf3   : > { %v1345_v10 = vpop.eup %1344  ;;  %v546_v11 = vsel %vm514_vm14, %v1343_v9, 0.0 }
  0xf4   : > { %563 = vst.msk [vmem:[%s1770_s28 + $0x68] sm:$0xff] %vm549_vm2, %v546_v11  ;;  %v545_v12 = vsel %vm513_vm15, %v1345_v10, 0.0 }
  0xf5   : > { %562 = vst.msk [vmem:[%s1770_s28 + $0x60] sm:$0xff] %vm549_vm2, %v545_v12 }
  0xf6   : > { %v1347_v13 = vpop.eup %1346 }
  0xf7   : > { %v1349_v14 = vpop.eup %1348  ;;  %v548_v15 = vsel %vm516_vm0, %v1347_v13, 0.0 }
  0xf8   : > { %565 = vst.msk [vmem:[%s1770_s28 + $0x78] sm:$0xff] %vm549_vm2, %v548_v15  ;;  %v547_v16 = vsel %vm515_vm1, %v1349_v14, 0.0 }
  0xf9   : > { %564 = vst.msk [vmem:[%s1770_s28 + $0x70] sm:$0xff] %vm549_vm2, %v547_v16 }
 0x115   : > { %v1237_v17 = vpop.f32.mrb[0].mxu0 }
 0x116   : > { %v1249_v18 = vpop.f32.mrb[0].mxu1  ;;  %v778_v19 = vmul.f32 %v1237_v17, %v1784_v44  ;;  %v698_v21 = vpop.f32.mrb[1].mxu0 }
 0x117   : > { %v786_v20 = vmul.f32 %v1249_v18, %v542_v3  ;;  %v738_v22 = vpop.f32.mrb[1].mxu1  ;;  %v777_v23 = vmul.f32 %v698_v21, %v1774_v36 }
 0x118   : > { %v785_v24 = vmul.f32 %v738_v22, %v541_v4 }
 0x119   : > { %v1172_v25 = vpack.c.bf16 %v778_v19, %v777_v23  ;;  %v1240_v27 = vpop.f32.mrb[2].mxu0 }
 0x11a   : > { %v1192_v26 = vpack.c.bf16 %v786_v20, %v785_v24  ;;  %v1252_v28 = vpop.f32.mrb[2].mxu1  ;;  %v780_v29 = vmul.f32 %v1240_v27, %v1782_v43  ;;  %v708_v31 = vpop.f32.mrb[3].mxu0 }
 0x11b   : > { %v788_v30 = vmul.f32 %v1252_v28, %v544_v7  ;;  %v748_v32 = vpop.f32.mrb[3].mxu1  ;;  %1173 = vst [vmem:[%s1832_s14] sm:$0xff] %v1172_v25   ;;  %v779_v33 = vmul.f32 %v708_v31, %v1772_v35 }
 0x11c   : > { %1212 = vst [vmem:[%s1832_s14 + $0x20] sm:$0xff] %v1192_v26   ;;  %v787_v34 = vmul.f32 %v748_v32, %v543_v8 }
 0x11d   : > { %v1177_v36 = vpack.c.bf16 %v780_v29, %v779_v33  ;;  %v1243_v38 = vpop.f32.mrb[4].mxu0 }
 0x11e   : > { %v1197_v37 = vpack.c.bf16 %v788_v30, %v787_v34  ;;  %v1255_v39 = vpop.f32.mrb[4].mxu1  ;;  %v782_v40 = vmul.f32 %v1243_v38, %v1792_v51  ;;  %v718_v42 = vpop.f32.mrb[5].mxu0 }
 0x11f   : > { %v790_v41 = vmul.f32 %v1255_v39, %v546_v11  ;;  %v758_v43 = vpop.f32.mrb[5].mxu1  ;;  %1209 = vst [vmem:[%s1832_s14 + $0x8] sm:$0xff] %v1177_v36   ;;  %v781_v44 = vmul.f32 %v718_v42, %v1797_v52 }
 0x120   : > { %1213 = vst [vmem:[%s1832_s14 + $0x28] sm:$0xff] %v1197_v37   ;;  %v789_v45 = vmul.f32 %v758_v43, %v545_v12 }
 0x121   : > { %v1182_v35 = vpack.c.bf16 %v782_v40, %v781_v44  ;;  %v1246_v47 = vpop.f32.mrb[6].mxu0 }
 0x122   : > { %v1202_v46 = vpack.c.bf16 %v790_v41, %v789_v45  ;;  %v1258_v48 = vpop.f32.mrb[6].mxu1  ;;  %v784_v49 = vmul.f32 %v1246_v47, %v1802_v59  ;;  %v728_v51 = vpop.f32.mrb[7].mxu0 }
 0x123   : > { %v792_v50 = vmul.f32 %v1258_v48, %v548_v15  ;;  %v768_v53 = vpop.f32.mrb[7].mxu1  ;;  %1210 = vst [vmem:[%s1832_s14 + $0x10] sm:$0xff] %v1182_v35   ;;  %v783_v52 = vmul.f32 %v728_v51, %v1807_v60 }
 0x124   : > { %1214 = vst [vmem:[%s1832_s14 + $0x30] sm:$0xff] %v1202_v46   ;;  %v791_v54 = vmul.f32 %v768_v53, %v547_v16 }
 0x125   : > { %v1187_v55 = vpack.c.bf16 %v784_v49, %v783_v52 }
 0x126   : > { %v1207_v56 = vpack.c.bf16 %v792_v50, %v791_v54 }
 0x127   : > { %1211 = vst [vmem:[%s1832_s14 + $0x18] sm:$0xff] %v1187_v55  }
 0x128   : > { %1215 = vst [vmem:[%s1832_s14 + $0x38] sm:$0xff] %v1207_v56  }
 0x129   : > { %1421 = shalt.err (!%p1418_p9)
}
 0x12a   : > { %s1422_s16 = scalar_lea.hbm %s1852_s10, 1024  ;;  %s1426_s28 = scalar_lea.hbm %s1903_s5, 2048 }
 0x12b   : > { %p1423_p1 = scmp.ne.s32.totalorder %s1852_s10, %s1422_s16  ;;  %p1427_p6 = scmp.lt.u32.totalorder %s1852_s10, %s1903_s5 }
 0x12c   : > { %p1428_p13 = scmp.lt.u32.totalorder %s1426_s28, %s1422_s16  ;;  %p1430_p10 = scmp.lt.u32.totalorder %s1422_s16, %s1852_s10 }
 0x12d   : > { %p1424_p3 = pnand %p1423_p1, %p1910_p12 }
 0x12e   : > { %p1429_p8 = por %p1428_p13, %p1427_p6 }
 0x12f   : > { %p1425_p11 = pneg %p1424_p3 }
 0x130   : > { %p1431_p0 = por %p1430_p10, %p1429_p8 }
 0x132   : > { %p1432_p2 = pnand %p1431_p0, %p1425_p11 }
 0x134   : > { %1435 = shalt.err (!%p1432_p2)
}
 0x135   : > { %s1487_s7 = smov 64   ;;  %s1488_s9 = smov 4  }
 0x136   : > { %1264 = dma.vmem_to_hbm [thread:$0]  (%p1910_p12), %s1844_s8, 1024, %s1852_s10, %s884_s22, %s1487_s7, %s1487_s7, %s1488_s9  }
 0x137 PF: > { %s933_s29 = sand.u32 1, %s1466_s18   ;;  %p1911_p4 = scmp.ne.s32.totalorder %s1908_s6, 0 }
 0x138   : > { %p1912_p5 = scmp.ge.s32.totalorder %s1478_s21, 2  ;;  %s934_s11 = scalar_lea.sflag [#allocation4], %s933_s29 }
 0x13a   : > { %p1272_p7 = pnand %p1912_p5, %p1911_p4 }
 0x13c   : > { %1457 = dma.done.wait (!%p1272_p7), %s934_s11, 2048  }
 0x13d   : > { %1459 = vsyncadd (!%p1272_p7), %s934_s11, 4294965248  ;;  %s951_s17 = scalar_lea.sflag [#allocation7], %s933_s29 }
 0x13e   : > { %1461 = dma.done.wait (!%p1272_p7), %s951_s17, 1024  }
 0x13f   : > { %1463 = vsyncadd (!%p1272_p7), %s951_s17, 4294966272  ;;  %p22_p12 = scmp.ge.s32.totalorder %s1544_s24, 4   ;;  %s1913_s18 = smov %s1470_s19 }
 0x140   : > { %s1914_s19 = smov %s1474_s20  ;;  %s1915_s20 = smov %s1556_s27 }
 0x141   : > { %s1916_s21 = smov %s1544_s24  ;;  %24 = sbr.rel (!%p22_p12) target bundleno = 7 (0x7), region = 109 }
 0x148   :  { %956 = vsyncpa [#allocation3], 1 }
 0x149   :  { %958 = vsyncpa [#allocation3 + $0x1], 1 }
 0x14a   :  { %959 = vsyncpa [#allocation4], 1 }
 0x14b   :  { %961 = vsyncpa [#allocation4 + $0x1], 1 }
 0x14c   :  { %962 = vsyncpa [#allocation7], 1 }
 0x14d   :  { %964 = vsyncpa [#allocation7 + $0x1], 1 }

</bundles_post_ra>
